<compile_context>
chip_gen: v5e
topology: v5e:2x2
jax: 0.10.0
libtpu: 0.0.40
codegen_flags: <defaults>
</compile_context>

<pallas_src>
import jax
import jax.numpy as jnp
from jax.experimental import pallas as pl
from jax.experimental.pallas import tpu as pltpu


def _round_up(x, m):
    return (x + m - 1) // m * m


def bpnet_kernel(x_ref, w1_ref, b1_ref, w2_ref, b2_ref, o_ref):
    # fc1: (TB, In)[bf16] @ (In, H)[bf16] -> f32 accumulation on the MXU.
    h = jnp.dot(x_ref[...], w1_ref[...], preferred_element_type=jnp.float32)
    h = h + b1_ref[...]                                   # f32 bias add (VPU)
    # Sigmoid in f32; exp and approx-reciprocal both run on the EUP slot.
    h = pl.reciprocal(1.0 + jnp.exp(-h), approx=True)
    # fc2: cast activations to bf16 for the MXU, accumulate in f32.
    out = jnp.dot(h.astype(w2_ref.dtype), w2_ref[...],
                  preferred_element_type=jnp.float32)
    o_ref[...] = (out + b2_ref[...]).astype(o_ref.dtype)


def bpnet_forward(x, w1, b1, w2, b2, *, batch_tile=None):
    """BpNet forward: sigmoid(x @ w1 + b1) @ w2 + b2.

    x : (B, In) float32
    w1: (In, H) float32   (pre-transposed vs. PyTorch's (out, in) layout)
    b1: (1, H)  float32
    w2: (H, Out) float32
    b2: (1, Out) float32
    Returns (B, Out) float32.
    """
    B, in_dim = x.shape
    hidden = w1.shape[1]
    out_dim = w2.shape[1]

    # --- batch tiling (largest reasonable tile; 512 rows for big batches) ---
    if batch_tile is None:
        if B >= 512:
            batch_tile = 512
        elif B >= 128:
            batch_tile = 128
        else:
            batch_tile = _round_up(B, 8)
    tb = batch_tile
    b_pad = _round_up(B, tb)

    # --- lane-dense output: pad Out up to a multiple of 128 lanes -----------
    out_pad = _round_up(out_dim, 128)

    # --- dtypes: stream x / weights as bf16, biases + accumulation in f32 ---
    x_p = jnp.zeros((b_pad, in_dim), jnp.bfloat16).at[:B].set(
        x.astype(jnp.bfloat16))
    w1_b = w1.astype(jnp.bfloat16)
    w2_p = jnp.zeros((hidden, out_pad), jnp.bfloat16).at[:, :out_dim].set(
        w2.astype(jnp.bfloat16))
    b2_p = jnp.zeros((1, out_pad), jnp.float32).at[:, :out_dim].set(b2)

    grid = (b_pad // tb,)

    out_padded = pl.pallas_call(
        bpnet_kernel,
        out_shape=jax.ShapeDtypeStruct((b_pad, out_pad), jnp.float32),
        grid_spec=pl.GridSpec(
            grid=grid,
            in_specs=[
                pl.BlockSpec((tb, in_dim), lambda i: (i, 0)),       # streamed x
                pl.BlockSpec((in_dim, hidden), lambda i: (0, 0)),   # resident w1
                pl.BlockSpec((1, hidden), lambda i: (0, 0)),        # resident b1
                pl.BlockSpec((hidden, out_pad), lambda i: (0, 0)),  # resident w2
                pl.BlockSpec((1, out_pad), lambda i: (0, 0)),       # resident b2
            ],
            out_specs=pl.BlockSpec((tb, out_pad), lambda i: (i, 0)),
        ),
        compiler_params=pltpu.CompilerParams(
            dimension_semantics=("parallel",),          # independent batch rows
            vmem_limit_bytes=32 * 1024 * 1024,          # > v5e's 16 MiB default
        ),
    )(x_p, w1_b, b1, w2_p, b2_p)

    return out_padded[:B, :out_dim]


def init_params(key, input_dim, hidden_dim, output_dim):
    """Deterministic init mimicking nn.Linear's U(-1/sqrt(fan_in), 1/sqrt(fan_in))."""
    k1, k2, k3, k4 = jax.random.split(key, 4)
    bound1 = 1.0 / jnp.sqrt(input_dim)
    bound2 = 1.0 / jnp.sqrt(hidden_dim)
    # Stored pre-transposed relative to PyTorch's (out, in) layout.
    w1 = jax.random.uniform(k1, (input_dim, hidden_dim), jnp.float32, -bound1, bound1)
    b1 = jax.random.uniform(k2, (1, hidden_dim), jnp.float32, -bound1, bound1)
    w2 = jax.random.uniform(k3, (hidden_dim, output_dim), jnp.float32, -bound2, bound2)
    b2 = jax.random.uniform(k4, (1, output_dim), jnp.float32, -bound2, bound2)
    return w1, b1, w2, b2


if __name__ == "__main__":
    input_dim, hidden_dim, output_dim = 16, 32, 8
    batch = 200   # not a multiple of the 128-row tile -> exercises pad + slice + 2-step grid

    key = jax.random.PRNGKey(0)
    kx, kp = jax.random.split(key)
    x = jax.random.normal(kx, (batch, input_dim), jnp.float32)
    w1, b1, w2, b2 = init_params(kp, input_dim, hidden_dim, output_dim)

    out = bpnet_forward(x, w1, b1, w2, b2)
    jax.block_until_ready(out)

    # Pure-JAX reference mirroring the kernel's bf16-stream / f32-accumulate numerics.
    xb = x.astype(jnp.bfloat16)
    w1b = w1.astype(jnp.bfloat16)
    w2b = w2.astype(jnp.bfloat16)
    h_ref = jax.nn.sigmoid(jnp.dot(xb, w1b, preferred_element_type=jnp.float32) + b1)
    ref = jnp.dot(h_ref.astype(jnp.bfloat16), w2b,
                  preferred_element_type=jnp.float32) + b2

    assert out.shape == (batch, output_dim)
    # Tolerance covers bf16 rounding + EUP approximate-reciprocal sigmoid.
    assert jnp.allclose(out, ref, atol=5e-2, rtol=5e-2), \
        float(jnp.max(jnp.abs(out - ref)))

    print("KERNEL_OK")
</pallas_src>

<mosaic_0001>
module attributes {stable_mosaic.version = 11 : i64} {
  func.func @bpnet_kernel(%arg0: i32, %arg1: memref<128x16xbf16, #tpu.memory_space<vmem>>, %arg2: memref<16x32xbf16, #tpu.memory_space<vmem>>, %arg3: memref<1x32xf32, #tpu.memory_space<vmem>>, %arg4: memref<32x128xbf16, #tpu.memory_space<vmem>>, %arg5: memref<1x128xf32, #tpu.memory_space<vmem>>, %arg6: memref<128x128xf32, #tpu.memory_space<vmem>>) attributes {dimension_semantics = [#tpu.dimension_semantics<parallel>], iteration_bounds = array<i64: 2>, scalar_prefetch = 0 : i64, scratch_operands = 0 : i64, tpu.core_type = #tpu.core_type<tc>, window_params = [{transform_indices = @transform_0, window_bounds = array<i64: 128, 16>}, {pipeline_mode = #tpu.pipeline_mode<synchronous>, transform_indices = @transform_1, window_bounds = array<i64: 16, 32>}, {pipeline_mode = #tpu.pipeline_mode<synchronous>, transform_indices = @transform_2, window_bounds = array<i64: 1, 32>}, {pipeline_mode = #tpu.pipeline_mode<synchronous>, transform_indices = @transform_3, window_bounds = array<i64: 32, 128>}, {pipeline_mode = #tpu.pipeline_mode<synchronous>, transform_indices = @transform_4, window_bounds = array<i64: 1, 128>}, {transform_indices = @transform_5, window_bounds = array<i64: 128, 128>}]} {
    %c0 = arith.constant 0 : index
    %c0_0 = arith.constant 0 : index
    %0 = vector.load %arg1[%c0, %c0_0] : memref<128x16xbf16, #tpu.memory_space<vmem>>, vector<128x16xbf16>
    %c0_1 = arith.constant 0 : index
    %c0_2 = arith.constant 0 : index
    %1 = vector.load %arg2[%c0_1, %c0_2] : memref<16x32xbf16, #tpu.memory_space<vmem>>, vector<16x32xbf16>
    %cst = arith.constant dense<0.000000e+00> : vector<128x32xf32>
    %2 = tpu.matmul %0, %1, %cst {dimension_numbers = #tpu.dot_dimension_numbers<[1], [0], [0], [1], [0, 0, 1, 1], [], []>} : vector<128x16xbf16>, vector<16x32xbf16>, vector<128x32xf32> -> vector<128x32xf32>
    %c0_3 = arith.constant 0 : index
    %c0_4 = arith.constant 0 : index
    %3 = vector.load %arg3[%c0_3, %c0_4] : memref<1x32xf32, #tpu.memory_space<vmem>>, vector<1x32xf32>
    %4 = vector.broadcast %3 : vector<1x32xf32> to vector<128x32xf32>
    %5 = arith.addf %2, %4 : vector<128x32xf32>
    %cst_5 = arith.constant 0.000000e+00 : f32
    %6 = vector.broadcast %cst_5 : f32 to vector<128x32xf32>
    %7 = arith.subf %6, %5 : vector<128x32xf32>
    %8 = math.exp %7 : vector<128x32xf32>
    %cst_6 = arith.constant 1.000000e+00 : f32
    %9 = vector.broadcast %cst_6 : f32 to vector<128x32xf32>
    %10 = arith.addf %9, %8 : vector<128x32xf32>
    %11 = tpu.reciprocal %10 {approx = true} : vector<128x32xf32> -> vector<128x32xf32>
    %12 = arith.truncf %11 : vector<128x32xf32> to vector<128x32xbf16>
    %c0_7 = arith.constant 0 : index
    %c0_8 = arith.constant 0 : index
    %13 = vector.load %arg4[%c0_7, %c0_8] : memref<32x128xbf16, #tpu.memory_space<vmem>>, vector<32x128xbf16>
    %cst_9 = arith.constant dense<0.000000e+00> : vector<128x128xf32>
    %14 = tpu.matmul %12, %13, %cst_9 {dimension_numbers = #tpu.dot_dimension_numbers<[1], [0], [0], [1], [0, 0, 1, 1], [], []>} : vector<128x32xbf16>, vector<32x128xbf16>, vector<128x128xf32> -> vector<128x128xf32>
    %c0_10 = arith.constant 0 : index
    %c0_11 = arith.constant 0 : index
    %15 = vector.load %arg5[%c0_10, %c0_11] : memref<1x128xf32, #tpu.memory_space<vmem>>, vector<1x128xf32>
    %16 = vector.broadcast %15 : vector<1x128xf32> to vector<128x128xf32>
    %17 = arith.addf %14, %16 : vector<128x128xf32>
    %c0_12 = arith.constant 0 : index
    %c0_13 = arith.constant 0 : index
    %18 = vector.load %arg6[%c0_12, %c0_13] : memref<128x128xf32, #tpu.memory_space<vmem>>, vector<128x128xf32>
    tpu.vector_store %arg6[%c0_12, %c0_13], %17 {strides = array<i32>} : memref<128x128xf32, #tpu.memory_space<vmem>>, vector<128x128xf32>,
    return
  }
  func.func @transform_0(%arg0: i32) -> (i32, i32) {
    %c0_i32 = arith.constant 0 : i32
    %c0_i32_0 = arith.constant 0 : i32
    return %arg0, %c0_i32 : i32, i32
  }
  func.func @transform_1(%arg0: i32) -> (i32, i32) {
    %c0_i32 = arith.constant 0 : i32
    %c0_i32_0 = arith.constant 0 : i32
    %c0_i32_1 = arith.constant 0 : i32
    return %c0_i32, %c0_i32_0 : i32, i32
  }
  func.func @transform_2(%arg0: i32) -> (i32, i32) {
    %c0_i32 = arith.constant 0 : i32
    %c0_i32_0 = arith.constant 0 : i32
    %c0_i32_1 = arith.constant 0 : i32
    return %c0_i32, %c0_i32_0 : i32, i32
  }
  func.func @transform_3(%arg0: i32) -> (i32, i32) {
    %c0_i32 = arith.constant 0 : i32
    %c0_i32_0 = arith.constant 0 : i32
    %c0_i32_1 = arith.constant 0 : i32
    return %c0_i32, %c0_i32_0 : i32, i32
  }
  func.func @transform_4(%arg0: i32) -> (i32, i32) {
    %c0_i32 = arith.constant 0 : i32
    %c0_i32_0 = arith.constant 0 : i32
    %c0_i32_1 = arith.constant 0 : i32
    return %c0_i32, %c0_i32_0 : i32, i32
  }
  func.func @transform_5(%arg0: i32) -> (i32, i32) {
    %c0_i32 = arith.constant 0 : i32
    %c0_i32_0 = arith.constant 0 : i32
    return %arg0, %c0_i32 : i32, i32
  }
}

</mosaic_0001>

<bundles_post_ra>
// kernel: tpu_custom_call.1
= control target key start
LH: loop header
LB: loop body
LE: loop exit
PB: predicated region body
PF: predicated region fallthrough
CT: control target
= control target key end

     0   :  { %10 = vsyncpa [#allocation3], 0  ;;  %s1091_s0 = inlined_call_operand.vmem [shape: bf16[256,16], index: 0, kind: input, shape index: {}]   ;;  %s1092_s1 = inlined_call_operand.vmem [shape: bf16[16,32], index: 1, kind: input, shape index: {}]   ;;  %s1093_s2 = inlined_call_operand.vmem [shape: f32[1,32], index: 2, kind: input, shape index: {}]   ;;  %s1094_s3 = inlined_call_operand.vmem [shape: bf16[32,128], index: 3, kind: input, shape index: {}]   ;;  %s1095_s4 = inlined_call_operand.vmem [shape: f32[1,128], index: 4, kind: input, shape index: {}]   ;;  %s1096_s5 = inlined_call_operand.hbm [shape: f32[256,128], index: 5, kind: output, shape index: {}]  }
   0x1   :  { %12 = vsyncpa [#allocation3 + $0x1], 0  ;;  %s935_s18 = smov 0   ;;  %s937_s19 = smov 0  }
   0x2   :  { %s939_s20 = smov 0   ;;  %s941_s21 = smov 0  }
   0x3 LB: > { %s956_s22 = sadd.s32 4294967295, %s901_s21   ;;  %s645_s23 = sadd.s32 4294967294, %s901_s21   ;;  %s901_s21 = sphi %s941_s21, %s1102_s21   ;;  %s897_s20 = sphi %s939_s20, %s1101_s20   ;;  %s893_s19 = sphi %s937_s19, %s1100_s19   ;;  %s889_s18 = sphi %s935_s18, %s1099_s18  }
   0x4   : > { %s960_s24 = sadd.s32 1, %s901_s21   ;;  %s135_s25 = sadd.s32 1, %s897_s20 }
   0x5   : > { %s132_s26 = ssub.s32 %s901_s21, %s960_s24  ;;  %p145_p0 = scmp.ne.s32.totalorder %s897_s20, %s893_s19 }
   0x6   : > { %p133_p1 = scmp.eq.s32.totalorder %s132_s26, 0  ;;  %p146_p2 = scmp.eq.s32.totalorder %s956_s22, 1 }
   0x7   : > { %p151_p3 = scmp.ne.s32.totalorder %s893_s19, %s889_s18  ;;  %p152_p4 = scmp.eq.s32.totalorder %s645_s23, 1 }
   0x8   : > { %s971_s27 = scalar_select %p133_p1, %s897_s20, %s135_s25  }
   0x9   : > { %p973_p5 = por %p146_p2, %p145_p0  ;;  %p977_p6 = por %p152_p4, %p151_p3 }
   0xa   : > { %p648_p7 = scmp.ge.s32.totalorder %s901_s21, 1  ;;  %p191_p8 = scmp.lt.s32.totalorder %s901_s21, 3 }
   0xc   : > { %p192_p9 = pnand %p648_p7, %p191_p8 }
   0xd   : > { %s650_s7 = sshll.u32 (!%p192_p9), %s956_s22, 4  ;;  %s216_s23 = sand.u32 (!%p192_p9), 1, %s893_s19  }
   0xe   : > { %195 = sbr.rel (%p192_p9) target bundleno = 439 (0x1b7), region = 40  ;;  %p220_p10 = scmp.lt.s32.totalorder (!%p192_p9), %s650_s7, 31 }
   0xf   : > { %s649_s25 = sshll.u32 (!%p192_p9), %s216_s23, 7  ;;  %s568_s13 = scalar_lea.sflag (!%p192_p9), [#allocation3], %s216_s23 }
  0x10   : > { %s1039_s6 = scalar_lea.vmem (!%p192_p9), [#allocation2], %s649_s25  ;;  %s859_s17 = scalar_lea.hbm (!%p192_p9), %s1096_s5, 256 }
  0x13   : > { %v725_v0 = vld [vmem:[%s1092_s1] sm:$0xff]  ;;  %s1104_s7 = smov (!%p220_p10, %s650_s7), 31  ;;  %vm295_vm0 = vcmask 130048   ;;  %v727_v9 = vld [vmem:[%s1094_s3 + $0x8] sm:$0xff]  ;;  %vm477_vm1 = vcmask 261120  }
  0x14   : > { %327 = vmatpush.bf16.msra.mxu0 %v725_v0  ;;  %729 = vmatpush.bf16.msra.mxu3 %v725_v0  ;;  %s651_s8 = sshll.u32 %s1104_s7, 2  ;;  %v726_v10 = vld [vmem:[%s1094_s3] sm:$0xff]  ;;  %s728_s7 = sshll.u32 %s956_s22, 7 }
  0x15   : > { %s223_s11 = scalar_lea.vmem %s1091_s0, %s651_s8  ;;  %508 = vmatpush.bf16.msra.mxu1 %v727_v9  ;;  %730 = vmatpush.bf16.msra.mxu2 %v727_v9  ;;  %v1007_v11 = vld [vmem:[%s1093_s2] ss:$0 sm:$0xff]  ;;  %s579_s10 = scalar_lea.hbm %s1096_s5, %s728_s7 }
  0x16   : > { %v717_v1 = vld [vmem:[%s223_s11] sm:$0xff]  ;;  %v718_v2 = vld [vmem:[%s223_s11 + $0x8] sm:$0xff]  ;;  %v719_v3 = vld [vmem:[%s223_s11 + $0x10] sm:$0xff]  ;;  %s582_s12 = sshll.u32 %s579_s10, 4  ;;  %s583_s12 = int_to_ptr.hbm [resolvable:$true] %s582_s12 }
  0x17   : > { %688 = vmatmul.msk.bf16.vlgmr.msra.gmra.mxu0 %vm295_vm0, %v717_v1  ;;  %v722_v4 = vld [vmem:[%s223_s11 + $0x28] sm:$0xff]  ;;  %v720_v5 = vld [vmem:[%s223_s11 + $0x18] sm:$0xff]  ;;  %v723_v6 = vld [vmem:[%s223_s11 + $0x30] sm:$0xff]  ;;  %s853_s14 = sshra.s32 %s583_s12, 4  ;;  %s854_s14 = int_to_ptr.hbm [resolvable:$true] %s853_s14 }
  0x18   : > { %693 = vmatmul.msk.bf16.vlgmr.msra.gmra.mxu3 %vm295_vm0, %v722_v4  ;;  %v721_v7 = vld [vmem:[%s223_s11 + $0x20] sm:$0xff]  ;;  %v724_v8 = vld [vmem:[%s223_s11 + $0x38] sm:$0xff]  ;;  %s580_s11 = sshll.u32 %s1039_s6, 4  ;;  %s855_s22 = scalar_lea.hbm %s854_s14, 128  ;;  %s581_s11 = int_to_ptr.vmem [resolvable:$true] %s580_s11 }
  0x19   : > { %509 = vmatpush.bf16.msra.mxu1 %v726_v10  ;;  %731 = vmatpush.bf16.msra.mxu2 %v726_v10  ;;  %p856_p11 = scmp.ne.s32.totalorder %s854_s14, %s855_s22  ;;  %p860_p0 = scmp.lt.s32.totalorder %s854_s14, %s1096_s5 }
  0x1a   : > { %p861_p1 = scmp.lt.s32.totalorder %s859_s17, %s855_s22 }
  0x1b   : > { %p857_p12 = pnand %p856_p11, %p973_p5 }
  0x1c   : > { %p862_p2 = por %p861_p1, %p860_p0 }
  0x1d   : > { %p858_p13 = pneg %p857_p12 }
  0x1f   : > { %p863_p3 = pnand %p862_p2, %p858_p13 }
  0x27   : > { %689 = vmatmul.msk.bf16.gmra.mxu0 %vm295_vm0, %v718_v2 }
  0x28   : > { %694 = vmatmul.msk.bf16.gmra.mxu3 %vm295_vm0, %v723_v6 }
  0x37   : > { %690 = vmatmul.msk.bf16.gmra.mxu0 %vm295_vm0, %v719_v3 }
  0x38   : > { %695 = vmatmul.msk.bf16.gmra.mxu3 %vm295_vm0, %v724_v8 }
  0x47   : > { %691 = vmatmul.msk.bf16.gmra.mxu0 %vm295_vm0, %v720_v5 }
  0x57   : > { %692 = vmatmul.msk.bf16.gmra.mxu0 %vm295_vm0, %v721_v7 }
  0x94   : > { %v329_v12 = vpop.f32.mrf.mxu0 }
  0x95   : > { %v330_v13 = vadd.f32 %v1007_v11, %v329_v12 }
  0x97   : > { %v369_v14 = vsub.f32 0.0, %v330_v13 }
  0x99   : > { %v385_v15 = vmul.f32 1.442695, %v369_v14 }
  0x9b   : > { %775 = vpow2.f32 %v385_v15  ;;  %v354_v59 = vpop.f32.mrf.mxu3 }
  0x9c   : > { %v331_v16 = vpop.f32.mrf.mxu0  ;;  %v355_v14 = vadd.f32 %v1007_v11, %v354_v59 }
  0x9d   : > { %v332_v17 = vadd.f32 %v1007_v11, %v331_v16 }
  0x9f   : > { %v370_v18 = vsub.f32 0.0, %v332_v17 }
  0xa1   : > { %v387_v19 = vmul.f32 1.442695, %v370_v18  ;;  %v776_v20 = vpop.eup %775 }
  0xa2   : > { %v417_v23 = vadd.f32 1.0, %v776_v20 }
  0xa3   : > { %777 = vpow2.f32 %v387_v19  ;;  %v356_v5 = vpop.f32.mrf.mxu3 }
  0xa4   : > { %v334_v21 = vpop.f32.mrf.mxu0  ;;  %779 = vrcp.f32 %v417_v23  ;;  %v357_v19 = vadd.f32 %v1007_v11, %v356_v5 }
  0xa5   : > { %v335_v22 = vadd.f32 %v1007_v11, %v334_v21  ;;  %v379_v21 = vsub.f32 0.0, %v355_v14 }
  0xa7   : > { %v371_v24 = vsub.f32 0.0, %v335_v22 }
  0xa9   : > { %v778_v25 = vpop.eup %777  ;;  %v389_v27 = vmul.f32 1.442695, %v371_v24  ;;  %v380_v24 = vsub.f32 0.0, %v357_v19 }
  0xaa   : > { %v418_v26 = vadd.f32 1.0, %v778_v25  ;;  %v780_v31 = vpop.eup %779  ;;  %v405_v25 = vmul.f32 1.442695, %v379_v21 }
  0xab   : > { %v359_v16 = vpop.f32.mrf.mxu3 }
  0xac   : > { %781 = vrcp.f32 %v418_v26  ;;  %v336_v28 = vpop.f32.mrf.mxu0 }
  0xad   : > { %v337_v29 = vadd.f32 %v1007_v11, %v336_v28  ;;  %783 = vpow2.f32 %v389_v27  ;;  %v407_v28 = vmul.f32 1.442695, %v380_v24 }
  0xaf   : > { %v372_v30 = vsub.f32 0.0, %v337_v29 }
  0xb1   : > { %v391_v32 = vmul.f32 1.442695, %v372_v30 }
  0xb2   : > { %v782_v33 = vpop.eup %781 }
  0xb3   : > { %785 = vpow2.f32 %v391_v32  ;;  %v449_v34 = vpack.c.bf16 %v782_v33, %v780_v31  ;;  %v784_v35 = vpop.eup %783  ;;  %v361_v30 = vpop.f32.mrf.mxu3  ;;  %v360_v32 = vadd.f32 %v1007_v11, %v359_v16 }
  0xb4   : > { %v339_v36 = vpop.f32.mrf.mxu0  ;;  %v419_v38 = vadd.f32 1.0, %v784_v35 }
  0xb5   : > { %v340_v37 = vadd.f32 %v1007_v11, %v339_v36  ;;  %704 = vmatmul.msk.bf16.vlgmr.msra.gmra.mxu1 %vm477_vm1, %v449_v34  ;;  %v362_v34 = vadd.f32 %v1007_v11, %v361_v30 }
  0xb6   : > { %787 = vrcp.f32 %v419_v38  ;;  %v381_v38 = vsub.f32 0.0, %v360_v32 }
  0xb7   : > { %v373_v39 = vsub.f32 0.0, %v340_v37 }
  0xb9   : > { %v786_v40 = vpop.eup %785  ;;  %v393_v42 = vmul.f32 1.442695, %v373_v39 }
  0xba   : > { %v420_v41 = vadd.f32 1.0, %v786_v40 }
  0xbb   : > { %v364_v39 = vpop.f32.mrf.mxu3 }
  0xbc   : > { %789 = vrcp.f32 %v420_v41  ;;  %v341_v43 = vpop.f32.mrf.mxu0  ;;  %v788_v46 = vpop.eup %787  ;;  %v382_v41 = vsub.f32 0.0, %v362_v34 }
  0xbd   : > { %v342_v44 = vadd.f32 %v1007_v11, %v341_v43  ;;  %791 = vpow2.f32 %v393_v42  ;;  %v409_v43 = vmul.f32 1.442695, %v381_v38 }
  0xbf   : > { %v374_v45 = vsub.f32 0.0, %v342_v44  ;;  %v411_v44 = vmul.f32 1.442695, %v382_v41 }
  0xc1   : > { %v395_v47 = vmul.f32 1.442695, %v374_v45 }
  0xc2   : > { %v790_v48 = vpop.eup %789 }
  0xc3   : > { %793 = vpow2.f32 %v395_v47  ;;  %v450_v49 = vpack.c.bf16 %v790_v48, %v788_v46  ;;  %v792_v50 = vpop.eup %791  ;;  %v366_v45 = vpop.f32.mrf.mxu3  ;;  %v365_v48 = vadd.f32 %v1007_v11, %v364_v39 }
  0xc4   : > { %v344_v51 = vpop.f32.mrf.mxu0  ;;  %v421_v53 = vadd.f32 1.0, %v792_v50 }
  0xc5   : > { %v345_v52 = vadd.f32 %v1007_v11, %v344_v51  ;;  %705 = vmatmul.msk.bf16.gmra.mxu1 %vm477_vm1, %v450_v49  ;;  %v367_v49 = vadd.f32 %v1007_v11, %v366_v45 }
  0xc6   : > { %795 = vrcp.f32 %v421_v53  ;;  %v383_v53 = vsub.f32 0.0, %v365_v48 }
  0xc7   : > { %v375_v54 = vsub.f32 0.0, %v345_v52 }
  0xc9   : > { %v794_v55 = vpop.eup %793  ;;  %v397_v57 = vmul.f32 1.442695, %v375_v54 }
  0xca   : > { %v422_v56 = vadd.f32 1.0, %v794_v55  ;;  %v384_v55 = vsub.f32 0.0, %v367_v49 }
  0xcc   : > { %797 = vrcp.f32 %v422_v56  ;;  %v346_v58 = vpop.f32.mrf.mxu0  ;;  %v796_v62 = vpop.eup %795 }
  0xcd   : > { %v347_v60 = vadd.f32 %v1007_v11, %v346_v58  ;;  %799 = vpow2.f32 %v397_v57  ;;  %v413_v57 = vmul.f32 1.442695, %v383_v53  ;;  %v415_v58 = vmul.f32 1.442695, %v384_v55 }
  0xcf   : > { %v376_v61 = vsub.f32 0.0, %v347_v60 }
  0xd1   : > { %v399_v63 = vmul.f32 1.442695, %v376_v61 }
  0xd2   : > { %v798_v0 = vpop.eup %797 }
  0xd3   : > { %801 = vpow2.f32 %v399_v63  ;;  %v451_v1 = vpack.c.bf16 %v798_v0, %v796_v62  ;;  %v800_v2 = vpop.eup %799 }
  0xd4   : > { %v349_v3 = vpop.f32.mrf.mxu0  ;;  %v423_v6 = vadd.f32 1.0, %v800_v2 }
  0xd5   : > { %v350_v4 = vadd.f32 %v1007_v11, %v349_v3  ;;  %706 = vmatmul.msk.bf16.gmra.mxu1 %vm477_vm1, %v451_v1 }
  0xd6   : > { %803 = vrcp.f32 %v423_v6 }
  0xd7   : > { %v377_v7 = vsub.f32 0.0, %v350_v4  ;;  %v774_v4 = vld [vmem:[%s1095_s4] ss:$0 sm:$0xff] }
  0xd9   : > { %v802_v8 = vpop.eup %801  ;;  %v401_v10 = vmul.f32 1.442695, %v377_v7 }
  0xda   : > { %v424_v9 = vadd.f32 1.0, %v802_v8 }
  0xdc   : > { %805 = vrcp.f32 %v424_v9  ;;  %v351_v12 = vpop.f32.mrf.mxu0  ;;  %v804_v17 = vpop.eup %803 }
  0xdd   : > { %v352_v13 = vadd.f32 %v1007_v11, %v351_v12  ;;  %807 = vpow2.f32 %v401_v10 }
  0xdf   : > { %v378_v15 = vsub.f32 0.0, %v352_v13 }
  0xe1   : > { %v403_v18 = vmul.f32 1.442695, %v378_v15 }
  0xe2   : > { %v806_v20 = vpop.eup %805 }
  0xe3   : > { %809 = vpow2.f32 %v403_v18  ;;  %v452_v22 = vpack.c.bf16 %v806_v20, %v804_v17  ;;  %v808_v23 = vpop.eup %807 }
  0xe4   : > { %v425_v26 = vadd.f32 1.0, %v808_v23  ;;  %811 = vpow2.f32 %v405_v25 }
  0xe5   : > { %707 = vmatmul.msk.bf16.gmra.mxu1 %vm477_vm1, %v452_v22 }
  0xe6   : > { %813 = vrcp.f32 %v425_v26 }
  0xe9   : > { %v810_v27 = vpop.eup %809 }
  0xea   : > { %v426_v29 = vadd.f32 1.0, %v810_v27  ;;  %v812_v31 = vpop.eup %811 }
  0xeb   : > { %v427_v40 = vadd.f32 1.0, %v812_v31 }
  0xec   : > { %815 = vrcp.f32 %v426_v29  ;;  %v814_v33 = vpop.eup %813 }
  0xed   : > { %817 = vpow2.f32 %v407_v28 }
  0xee   : > { %819 = vrcp.f32 %v427_v40 }
  0xf2   : > { %v816_v35 = vpop.eup %815 }
  0xf3   : > { %v818_v36 = vpop.eup %817  ;;  %v453_v37 = vpack.c.bf16 %v816_v35, %v814_v33 }
  0xf4   : > { %v428_v42 = vadd.f32 1.0, %v818_v36  ;;  %v820_v46 = vpop.eup %819 }
  0xf5   : > { %708 = vmatmul.msk.bf16.vlgmr.msra.gmra.mxu2 %vm477_vm1, %v453_v37 }
  0xf6   : > { %821 = vrcp.f32 %v428_v42 }
  0xf7   : > { %823 = vpow2.f32 %v409_v43 }
  0xf8   : > { %825 = vpow2.f32 %v411_v44 }
  0xfc   : > { %v822_v47 = vpop.eup %821 }
  0xfd   : > { %v824_v50 = vpop.eup %823  ;;  %v454_v52 = vpack.c.bf16 %v822_v47, %v820_v46 }
  0xfe   : > { %v826_v51 = vpop.eup %825  ;;  %v429_v54 = vadd.f32 1.0, %v824_v50 }
  0xff   : > { %v430_v56 = vadd.f32 1.0, %v826_v51 }
 0x100   : > { %827 = vrcp.f32 %v429_v54 }
 0x101   : > { %829 = vrcp.f32 %v430_v56 }
 0x102   : > { %831 = vpow2.f32 %v413_v57 }
 0x103   : > { %833 = vpow2.f32 %v415_v58 }
 0x105   : > { %709 = vmatmul.msk.bf16.gmra.mxu2 %vm477_vm1, %v454_v52 }
 0x106   : > { %v828_v59 = vpop.eup %827 }
 0x107   : > { %v830_v60 = vpop.eup %829 }
 0x108   : > { %v832_v11 = vpop.eup %831  ;;  %v455_v62 = vpack.c.bf16 %v830_v60, %v828_v59 }
 0x109   : > { %v834_v61 = vpop.eup %833  ;;  %v431_v63 = vadd.f32 1.0, %v832_v11 }
 0x10a   : > { %v432_v0 = vadd.f32 1.0, %v834_v61 }
 0x10b   : > { %835 = vrcp.f32 %v431_v63 }
 0x10c   : > { %837 = vrcp.f32 %v432_v0 }
 0x111   : > { %v836_v1 = vpop.eup %835 }
 0x112   : > { %v838_v2 = vpop.eup %837 }
 0x113   : > { %v456_v3 = vpack.c.bf16 %v838_v2, %v836_v1 }
 0x115   : > { %710 = vmatmul.msk.bf16.gmra.mxu2 %vm477_vm1, %v455_v62 }
 0x125   : > { %711 = vmatmul.msk.bf16.gmra.mxu2 %vm477_vm1, %v456_v3 }
 0x132   : > { %v511_v5 = vpop.f32.mrf.mxu1 }
 0x133   : > { %v512_v6 = vadd.f32 %v774_v4, %v511_v5 }
 0x135   : > { %551 = vst [vmem:[%s1039_s6] sm:$0xff] %v512_v6 }
 0x13a   : > { %v513_v7 = vpop.f32.mrf.mxu1 }
 0x13b   : > { %v514_v8 = vadd.f32 %v774_v4, %v513_v7 }
 0x13d   : > { %552 = vst [vmem:[%s1039_s6 + $0x8] sm:$0xff] %v514_v8 }
 0x142   : > { %v516_v9 = vpop.f32.mrf.mxu1 }
 0x143   : > { %v517_v10 = vadd.f32 %v774_v4, %v516_v9 }
 0x145   : > { %553 = vst [vmem:[%s1039_s6 + $0x10] sm:$0xff] %v517_v10 }
 0x14a   : > { %v518_v12 = vpop.f32.mrf.mxu1 }
 0x14b   : > { %v519_v13 = vadd.f32 %v774_v4, %v518_v12 }
 0x14d   : > { %554 = vst [vmem:[%s1039_s6 + $0x18] sm:$0xff] %v519_v13 }
 0x152   : > { %v521_v14 = vpop.f32.mrf.mxu1 }
 0x153   : > { %v522_v15 = vadd.f32 %v774_v4, %v521_v14 }
 0x155   : > { %555 = vst [vmem:[%s1039_s6 + $0x20] sm:$0xff] %v522_v15 }
 0x15a   : > { %v523_v16 = vpop.f32.mrf.mxu1 }
 0x15b   : > { %v524_v17 = vadd.f32 %v774_v4, %v523_v16 }
 0x15d   : > { %556 = vst [vmem:[%s1039_s6 + $0x28] sm:$0xff] %v524_v17 }
 0x162   : > { %v526_v18 = vpop.f32.mrf.mxu1 }
 0x163   : > { %v527_v19 = vadd.f32 %v774_v4, %v526_v18 }
 0x165   : > { %557 = vst [vmem:[%s1039_s6 + $0x30] sm:$0xff] %v527_v19 }
 0x16a   : > { %v528_v20 = vpop.f32.mrf.mxu1 }
 0x16b   : > { %v529_v21 = vadd.f32 %v774_v4, %v528_v20 }
 0x16d   : > { %558 = vst [vmem:[%s1039_s6 + $0x38] sm:$0xff] %v529_v21 }
 0x178   : > { %v531_v22 = vpop.f32.mrf.mxu2 }
 0x179   : > { %v532_v23 = vadd.f32 %v774_v4, %v531_v22 }
 0x17b   : > { %559 = vst [vmem:[%s1039_s6 + $0x40] sm:$0xff] %v532_v23 }
 0x180   : > { %v533_v24 = vpop.f32.mrf.mxu2 }
 0x181   : > { %v534_v25 = vadd.f32 %v774_v4, %v533_v24 }
 0x183   : > { %560 = vst [vmem:[%s1039_s6 + $0x48] sm:$0xff] %v534_v25 }
 0x188   : > { %v536_v26 = vpop.f32.mrf.mxu2 }
 0x189   : > { %v537_v27 = vadd.f32 %v774_v4, %v536_v26 }
 0x18b   : > { %561 = vst [vmem:[%s1039_s6 + $0x50] sm:$0xff] %v537_v27 }
 0x190   : > { %v538_v28 = vpop.f32.mrf.mxu2 }
 0x191   : > { %v539_v29 = vadd.f32 %v774_v4, %v538_v28 }
 0x193   : > { %562 = vst [vmem:[%s1039_s6 + $0x58] sm:$0xff] %v539_v29 }
 0x198   : > { %v541_v30 = vpop.f32.mrf.mxu2 }
 0x199   : > { %v542_v31 = vadd.f32 %v774_v4, %v541_v30 }
 0x19b   : > { %563 = vst [vmem:[%s1039_s6 + $0x60] sm:$0xff] %v542_v31 }
 0x1a0   : > { %v543_v32 = vpop.f32.mrf.mxu2 }
 0x1a1   : > { %v544_v33 = vadd.f32 %v774_v4, %v543_v32 }
 0x1a3   : > { %564 = vst [vmem:[%s1039_s6 + $0x68] sm:$0xff] %v544_v33 }
 0x1a8   : > { %v546_v34 = vpop.f32.mrf.mxu2 }
 0x1a9   : > { %v547_v35 = vadd.f32 %v774_v4, %v546_v34 }
 0x1ab   : > { %565 = vst [vmem:[%s1039_s6 + $0x70] sm:$0xff] %v547_v35 }
 0x1b0   : > { %v548_v36 = vpop.f32.mrf.mxu2 }
 0x1b1   : > { %v549_v37 = vadd.f32 %v774_v4, %v548_v36 }
 0x1b3   : > { %566 = vst [vmem:[%s1039_s6 + $0x78] sm:$0xff] %v549_v37 }
 0x1b4   : > { %866 = shalt.err (!%p863_p3)
}
 0x1b5   : > { %s903_s23 = smov 128   ;;  %s904_s30 = smov 8  }
 0x1b6   : > { %732 = dma.vmem_to_hbm [thread:$0]  (%p973_p5), %s581_s11, 2048, %s583_s12, %s568_s13, %s903_s23, %s903_s23, %s904_s30  }
 0x1b7 PF: > { %p738_p4 = scmp.ge.s32.totalorder %s901_s21, 2  ;;  %s597_s6 = sand.u32 1, %s889_s18  }
 0x1b8   : > { %s598_s7 = scalar_lea.sflag [#allocation3], %s597_s6 }
 0x1b9   : > { %p735_p7 = pnand %p738_p4, %p977_p6 }
 0x1bb   : > { %p736_p8 = pneg %p735_p7 }
 0x1bd   : > { %884 = dma.done.wait (%p736_p8), %s598_s7, 2048  }
 0x1be   : > { %886 = vsyncadd (%p736_p8), %s598_s7, 4294965248  ;;  %p15_p9 = scmp.ge.s32.totalorder %s960_s24, 4   ;;  %s1099_s18 = smov %s893_s19 }
 0x1bf   : > { %s1100_s19 = smov %s897_s20  ;;  %s1101_s20 = smov %s971_s27 }
 0x1c0   : > { %s1102_s21 = smov %s960_s24  ;;  %17 = sbr.rel (!%p15_p9) target bundleno = 3 (0x3), region = 75 }
 0x1c5   :  { %604 = vsyncpa [#allocation3], 1 }
 0x1c6   :  { %606 = vsyncpa [#allocation3 + $0x1], 1 }

</bundles_post_ra>
